<compile_context>
chip_gen: v5e
topology: v5e:2x2
jax: 0.10.0
libtpu: 0.0.40
codegen_flags: <defaults>
</compile_context>

<pallas_src>
import jax
import jax.numpy as jnp
from jax.experimental import pallas as pl
from jax.experimental.pallas import tpu as pltpu

_LANE = 128  # f32 vreg lane width; batch tiles are multiples of this


def _hidden_chain_T(xt, w1, b1, w2, b2, w3, b3):
    """Transposed (feature-major) hidden stack.

    xt: (n_feature, bt) bf16, batch on lanes.
    wN: (out, in) bf16 (PyTorch nn.Linear layout).  bN: (out, 1) f32.
    Returns h3^T: (n_hidden3, bt) f32.
    """
    h = jnp.maximum(jnp.dot(w1, xt, preferred_element_type=jnp.float32) + b1, 0.0)
    h = jnp.maximum(jnp.dot(w2, h.astype(jnp.bfloat16),
                            preferred_element_type=jnp.float32) + b2, 0.0)
    h = jnp.maximum(jnp.dot(w3, h.astype(jnp.bfloat16),
                            preferred_element_type=jnp.float32) + b3, 0.0)
    return h


def _mlp_kernel_out1(xt_ref, w1_ref, b1_ref, w2_ref, b2_ref, w3_ref, b3_ref,
                     w4col_ref, b4_ref, o_ref):
    """n_output == 1 path. o_ref block: (1, bt), batch on lanes (lane-dense)."""
    h3 = _hidden_chain_T(xt_ref[...], w1_ref[...], b1_ref[...], w2_ref[...],
                         b2_ref[...], w3_ref[...], b3_ref[...])
    # Final n_hidden3 -> 1 contraction on VPU (broadcast-mul) + XLU sublane reduce:
    # no near-empty MXU pass, result already lane-major, one dense store per tile.
    out = jnp.sum(h3 * w4col_ref[...], axis=0, keepdims=True) + b4_ref[...]
    o_ref[...] = out.astype(o_ref.dtype)


def _mlp_kernel_general(xt_ref, w1_ref, b1_ref, w2_ref, b2_ref, w3_ref, b3_ref,
                        w4_ref, b4_ref, o_ref):
    """General n_output path. o_ref block: (n_output, bt), lane-dense last dim."""
    h3 = _hidden_chain_T(xt_ref[...], w1_ref[...], b1_ref[...], w2_ref[...],
                         b2_ref[...], w3_ref[...], b3_ref[...])
    out = jnp.dot(w4_ref[...], h3.astype(jnp.bfloat16),
                  preferred_element_type=jnp.float32) + b4_ref[...]
    o_ref[...] = out.astype(o_ref.dtype)


def mlp_forward(x, params, *, batch_tile=4096):
    """x: [B, n_feature] f32; params: wN as [out, in] (nn.Linear layout), bN as [out, 1]."""
    B, n_feature = x.shape
    n_output = params["w4"].shape[0]

    # ---- batch tiling: lane-aligned tiles, >=2 grid steps whenever possible -------
    b128 = pl.cdiv(B, _LANE) * _LANE
    bt = max(_LANE, (batch_tile // _LANE) * _LANE)
    if b128 <= bt:
        # Whole batch would fit one tile: split it in two (when the batch allows it)
        # so both v7x TensorCores get work via dimension_semantics=("parallel",).
        bt = max(_LANE, pl.cdiv(b128, 2 * _LANE) * _LANE)
    B_pad = pl.cdiv(B, bt) * bt
    grid = (B_pad // bt,)

    # ---- batch-on-lanes layout + bf16 matmul inputs (f32 accumulate) ---------------
    xt = jnp.pad(x, ((0, B_pad - B), (0, 0))).T.astype(jnp.bfloat16)  # (n_feature, B_pad)
    w1 = params["w1"].astype(jnp.bfloat16)
    w2 = params["w2"].astype(jnp.bfloat16)
    w3 = params["w3"].astype(jnp.bfloat16)
    b1, b2, b3, b4 = params["b1"], params["b2"], params["b3"], params["b4"]

    # Weights/biases are a few KiB: whole-array constant-index blocks, VMEM resident.
    def cspec(a):
        return pl.BlockSpec(a.shape, lambda i: (0,) * a.ndim)

    xt_spec = pl.BlockSpec((n_feature, bt), lambda i: (0, i))
    cparams = pltpu.CompilerParams(dimension_semantics=("parallel",))
    hidden_args = [w1, b1, w2, b2, w3, b3]
    hidden_specs = [cspec(a) for a in hidden_args]

    # VMEM budget at bt=4096: x block 2*8*4096*2 B, out block 2*n_out*4096*4 B,
    # weights a few KiB, layer temporaries ~1-2 MiB -- far below the 32 MiB scoped
    # default on every generation (incl. v7x), so no vmem_limit_bytes override.
    if n_output == 1:
        w4col = params["w4"].reshape(-1, 1)          # (n_hidden3, 1) f32 for the VPU path
        out_t = pl.pallas_call(
            _mlp_kernel_out1,
            out_shape=jax.ShapeDtypeStruct((1, B_pad), jnp.float32),
            grid_spec=pltpu.PrefetchScalarGridSpec(
                num_scalar_prefetch=0,
                grid=grid,
                in_specs=[xt_spec, *hidden_specs, cspec(w4col), cspec(b4)],
                out_specs=pl.BlockSpec((1, bt), lambda i: (0, i)),
            ),
            compiler_params=cparams,
        )(xt, *hidden_args, w4col, b4)
    else:
        w4 = params["w4"].astype(jnp.bfloat16)       # (n_output, n_hidden3) for the MXU
        out_t = pl.pallas_call(
            _mlp_kernel_general,
            out_shape=jax.ShapeDtypeStruct((n_output, B_pad), jnp.float32),
            grid_spec=pltpu.PrefetchScalarGridSpec(
                num_scalar_prefetch=0,
                grid=grid,
                in_specs=[xt_spec, *hidden_specs, cspec(w4), cspec(b4)],
                out_specs=pl.BlockSpec((n_output, bt), lambda i: (0, i)),
            ),
            compiler_params=cparams,
        )(xt, *hidden_args, w4, b4)

    # (n_output, B_pad) -> (B, n_output); padded garbage rows are sliced off here.
    return out_t.T[:B]


def init_params(key, n_feature, n_hidden1, n_hidden2, n_hidden3, n_output):
    """Deterministic init mimicking nn.Linear (uniform +/- 1/sqrt(fan_in)).
    Weights stored PyTorch-style as [out, in]; biases as [out, 1]."""
    dims = [(n_feature, n_hidden1), (n_hidden1, n_hidden2),
            (n_hidden2, n_hidden3), (n_hidden3, n_output)]
    params = {}
    for idx, (fan_in, fan_out) in enumerate(dims, start=1):
        key, kw, kb = jax.random.split(key, 3)
        bound = float(fan_in) ** -0.5
        params[f"w{idx}"] = jax.random.uniform(
            kw, (fan_out, fan_in), jnp.float32, -bound, bound)
        params[f"b{idx}"] = jax.random.uniform(
            kb, (fan_out, 1), jnp.float32, -bound, bound)
    return params


def mlp_reference(x, params):
    """Pure-JAX f32 reference matching the PyTorch module."""
    h = x
    for idx in range(1, 4):
        h = jnp.maximum(h @ params[f"w{idx}"].T + params[f"b{idx}"].T, 0.0)
    return h @ params["w4"].T + params["b4"].T


if __name__ == "__main__":
    key = jax.random.PRNGKey(0)
    n_feature, n_hidden1, n_hidden2, n_hidden3 = 8, 32, 32, 16
    # bf16 matmul inputs (f32 accumulate) -> loosened tolerance vs the f32 reference.
    TOL = dict(atol=5e-2, rtol=5e-2)

    # Case 1: regression head (n_output=1); batch splits into a 2-step grid so the
    # x DMA / writeback pipeline and v7x megacore sharding are both exercised.
    key, kp, kx = jax.random.split(key, 3)
    params = init_params(kp, n_feature, n_hidden1, n_hidden2, n_hidden3, 1)
    x = jax.random.normal(kx, (2048, n_feature), jnp.float32)
    out = jax.block_until_ready(mlp_forward(x, params))
    assert out.shape == (2048, 1)
    assert jnp.allclose(out, mlp_reference(x, params), **TOL)

    # Case 2: ragged batch (pad-to-tile + tail slice handling).
    key, kx2 = jax.random.split(key)
    x2 = jax.random.normal(kx2, (300, n_feature), jnp.float32)
    out2 = jax.block_until_ready(mlp_forward(x2, params))
    assert out2.shape == (300, 1)
    assert jnp.allclose(out2, mlp_reference(x2, params), **TOL)

    # Case 3: generic n_output (MXU final layer, lane-dense (n_output, B) output).
    key, kp3, kx3 = jax.random.split(key, 3)
    params3 = init_params(kp3, n_feature, n_hidden1, n_hidden2, n_hidden3, 8)
    x3 = jax.random.normal(kx3, (512, n_feature), jnp.float32)
    out3 = jax.block_until_ready(mlp_forward(x3, params3))
    assert out3.shape == (512, 8)
    assert jnp.allclose(out3, mlp_reference(x3, params3), **TOL)

    print("KERNEL_OK")
</pallas_src>

<mosaic_0001>
module attributes {stable_mosaic.version = 11 : i64} {
  func.func @_mlp_kernel_out1(%arg0: i32, %arg1: memref<8x1024xbf16, #tpu.memory_space<vmem>>, %arg2: memref<32x8xbf16, #tpu.memory_space<vmem>>, %arg3: memref<32x1xf32, #tpu.memory_space<vmem>>, %arg4: memref<32x32xbf16, #tpu.memory_space<vmem>>, %arg5: memref<32x1xf32, #tpu.memory_space<vmem>>, %arg6: memref<16x32xbf16, #tpu.memory_space<vmem>>, %arg7: memref<16x1xf32, #tpu.memory_space<vmem>>, %arg8: memref<16x1xf32, #tpu.memory_space<vmem>>, %arg9: memref<1x1xf32, #tpu.memory_space<vmem>>, %arg10: memref<1x1024xf32, #tpu.memory_space<vmem>>) attributes {dimension_semantics = [#tpu.dimension_semantics<parallel>], iteration_bounds = array<i64: 2>, scalar_prefetch = 0 : i64, scratch_operands = 0 : i64, tpu.core_type = #tpu.core_type<tc>, window_params = [{transform_indices = @transform_0, window_bounds = array<i64: 8, 1024>}, {pipeline_mode = #tpu.pipeline_mode<synchronous>, transform_indices = @transform_1, window_bounds = array<i64: 32, 8>}, {pipeline_mode = #tpu.pipeline_mode<synchronous>, transform_indices = @transform_2, window_bounds = array<i64: 32, 1>}, {pipeline_mode = #tpu.pipeline_mode<synchronous>, transform_indices = @transform_3, window_bounds = array<i64: 32, 32>}, {pipeline_mode = #tpu.pipeline_mode<synchronous>, transform_indices = @transform_4, window_bounds = array<i64: 32, 1>}, {pipeline_mode = #tpu.pipeline_mode<synchronous>, transform_indices = @transform_5, window_bounds = array<i64: 16, 32>}, {pipeline_mode = #tpu.pipeline_mode<synchronous>, transform_indices = @transform_6, window_bounds = array<i64: 16, 1>}, {pipeline_mode = #tpu.pipeline_mode<synchronous>, transform_indices = @transform_7, window_bounds = array<i64: 16, 1>}, {pipeline_mode = #tpu.pipeline_mode<synchronous>, transform_indices = @transform_8, window_bounds = array<i64: 1, 1>}, {transform_indices = @transform_9, window_bounds = array<i64: 1, 1024>}]} {
    %c0 = arith.constant 0 : index
    %c0_0 = arith.constant 0 : index
    %0 = vector.load %arg1[%c0, %c0_0] : memref<8x1024xbf16, #tpu.memory_space<vmem>>, vector<8x1024xbf16>
    %c0_1 = arith.constant 0 : index
    %c0_2 = arith.constant 0 : index
    %1 = vector.load %arg2[%c0_1, %c0_2] : memref<32x8xbf16, #tpu.memory_space<vmem>>, vector<32x8xbf16>
    %c0_3 = arith.constant 0 : index
    %c0_4 = arith.constant 0 : index
    %2 = vector.load %arg3[%c0_3, %c0_4] : memref<32x1xf32, #tpu.memory_space<vmem>>, vector<32x1xf32>
    %c0_5 = arith.constant 0 : index
    %c0_6 = arith.constant 0 : index
    %3 = vector.load %arg4[%c0_5, %c0_6] : memref<32x32xbf16, #tpu.memory_space<vmem>>, vector<32x32xbf16>
    %c0_7 = arith.constant 0 : index
    %c0_8 = arith.constant 0 : index
    %4 = vector.load %arg5[%c0_7, %c0_8] : memref<32x1xf32, #tpu.memory_space<vmem>>, vector<32x1xf32>
    %c0_9 = arith.constant 0 : index
    %c0_10 = arith.constant 0 : index
    %5 = vector.load %arg6[%c0_9, %c0_10] : memref<16x32xbf16, #tpu.memory_space<vmem>>, vector<16x32xbf16>
    %c0_11 = arith.constant 0 : index
    %c0_12 = arith.constant 0 : index
    %6 = vector.load %arg7[%c0_11, %c0_12] : memref<16x1xf32, #tpu.memory_space<vmem>>, vector<16x1xf32>
    %cst = arith.constant dense<0.000000e+00> : vector<32x1024xf32>
    %7 = tpu.matmul %1, %0, %cst {dimension_numbers = #tpu.dot_dimension_numbers<[1], [0], [0], [1], [0, 0, 1, 1], [], []>} : vector<32x8xbf16>, vector<8x1024xbf16>, vector<32x1024xf32> -> vector<32x1024xf32>
    %8 = vector.broadcast %2 : vector<32x1xf32> to vector<32x1024xf32>
    %9 = arith.addf %7, %8 : vector<32x1024xf32>
    %cst_13 = arith.constant 0.000000e+00 : f32
    %10 = vector.broadcast %cst_13 : f32 to vector<32x1024xf32>
    %11 = arith.maximumf %9, %10 : vector<32x1024xf32>
    %12 = arith.truncf %11 : vector<32x1024xf32> to vector<32x1024xbf16>
    %cst_14 = arith.constant dense<0.000000e+00> : vector<32x1024xf32>
    %13 = tpu.matmul %3, %12, %cst_14 {dimension_numbers = #tpu.dot_dimension_numbers<[1], [0], [0], [1], [0, 0, 1, 1], [], []>} : vector<32x32xbf16>, vector<32x1024xbf16>, vector<32x1024xf32> -> vector<32x1024xf32>
    %14 = vector.broadcast %4 : vector<32x1xf32> to vector<32x1024xf32>
    %15 = arith.addf %13, %14 : vector<32x1024xf32>
    %cst_15 = arith.constant 0.000000e+00 : f32
    %16 = vector.broadcast %cst_15 : f32 to vector<32x1024xf32>
    %17 = arith.maximumf %15, %16 : vector<32x1024xf32>
    %18 = arith.truncf %17 : vector<32x1024xf32> to vector<32x1024xbf16>
    %cst_16 = arith.constant dense<0.000000e+00> : vector<16x1024xf32>
    %19 = tpu.matmul %5, %18, %cst_16 {dimension_numbers = #tpu.dot_dimension_numbers<[1], [0], [0], [1], [0, 0, 1, 1], [], []>} : vector<16x32xbf16>, vector<32x1024xbf16>, vector<16x1024xf32> -> vector<16x1024xf32>
    %20 = vector.broadcast %6 : vector<16x1xf32> to vector<16x1024xf32>
    %21 = arith.addf %19, %20 : vector<16x1024xf32>
    %cst_17 = arith.constant 0.000000e+00 : f32
    %22 = vector.broadcast %cst_17 : f32 to vector<16x1024xf32>
    %23 = arith.maximumf %21, %22 : vector<16x1024xf32>
    %c0_18 = arith.constant 0 : index
    %c0_19 = arith.constant 0 : index
    %24 = vector.load %arg8[%c0_18, %c0_19] : memref<16x1xf32, #tpu.memory_space<vmem>>, vector<16x1xf32>
    %25 = vector.broadcast %24 : vector<16x1xf32> to vector<16x1024xf32>
    %26 = arith.mulf %23, %25 : vector<16x1024xf32>
    %cst_20 = arith.constant dense<0.000000e+00> : vector<1024xf32>
    %27 = vector.multi_reduction <add>, %26, %cst_20 [0] : vector<16x1024xf32> to vector<1024xf32>
    %28 = vector.shape_cast %27 : vector<1024xf32> to vector<1x1024xf32>
    %c0_21 = arith.constant 0 : index
    %c0_22 = arith.constant 0 : index
    %29 = vector.load %arg9[%c0_21, %c0_22] : memref<1x1xf32, #tpu.memory_space<vmem>>, vector<1x1xf32>
    %30 = vector.broadcast %29 : vector<1x1xf32> to vector<1x1024xf32>
    %31 = arith.addf %28, %30 : vector<1x1024xf32>
    %c0_23 = arith.constant 0 : index
    %c0_24 = arith.constant 0 : index
    %32 = vector.load %arg10[%c0_23, %c0_24] : memref<1x1024xf32, #tpu.memory_space<vmem>>, vector<1x1024xf32>
    tpu.vector_store %arg10[%c0_23, %c0_24], %31 {strides = array<i32>} : memref<1x1024xf32, #tpu.memory_space<vmem>>, vector<1x1024xf32>,
    return
  }
  func.func @transform_0(%arg0: i32) -> (i32, i32) {
    %c0_i32 = arith.constant 0 : i32
    %c0_i32_0 = arith.constant 0 : i32
    return %c0_i32, %arg0 : i32, i32
  }
  func.func @transform_1(%arg0: i32) -> (i32, i32) {
    %c0_i32 = arith.constant 0 : i32
    %c0_i32_0 = arith.constant 0 : i32
    %c0_i32_1 = arith.constant 0 : i32
    return %c0_i32, %c0_i32_0 : i32, i32
  }
  func.func @transform_2(%arg0: i32) -> (i32, i32) {
    %c0_i32 = arith.constant 0 : i32
    %c0_i32_0 = arith.constant 0 : i32
    %c0_i32_1 = arith.constant 0 : i32
    return %c0_i32, %c0_i32_0 : i32, i32
  }
  func.func @transform_3(%arg0: i32) -> (i32, i32) {
    %c0_i32 = arith.constant 0 : i32
    %c0_i32_0 = arith.constant 0 : i32
    %c0_i32_1 = arith.constant 0 : i32
    return %c0_i32, %c0_i32_0 : i32, i32
  }
  func.func @transform_4(%arg0: i32) -> (i32, i32) {
    %c0_i32 = arith.constant 0 : i32
    %c0_i32_0 = arith.constant 0 : i32
    %c0_i32_1 = arith.constant 0 : i32
    return %c0_i32, %c0_i32_0 : i32, i32
  }
  func.func @transform_5(%arg0: i32) -> (i32, i32) {
    %c0_i32 = arith.constant 0 : i32
    %c0_i32_0 = arith.constant 0 : i32
    %c0_i32_1 = arith.constant 0 : i32
    return %c0_i32, %c0_i32_0 : i32, i32
  }
  func.func @transform_6(%arg0: i32) -> (i32, i32) {
    %c0_i32 = arith.constant 0 : i32
    %c0_i32_0 = arith.constant 0 : i32
    %c0_i32_1 = arith.constant 0 : i32
    return %c0_i32, %c0_i32_0 : i32, i32
  }
  func.func @transform_7(%arg0: i32) -> (i32, i32) {
    %c0_i32 = arith.constant 0 : i32
    %c0_i32_0 = arith.constant 0 : i32
    %c0_i32_1 = arith.constant 0 : i32
    return %c0_i32, %c0_i32_0 : i32, i32
  }
  func.func @transform_8(%arg0: i32) -> (i32, i32) {
    %c0_i32 = arith.constant 0 : i32
    %c0_i32_0 = arith.constant 0 : i32
    %c0_i32_1 = arith.constant 0 : i32
    return %c0_i32, %c0_i32_0 : i32, i32
  }
  func.func @transform_9(%arg0: i32) -> (i32, i32) {
    %c0_i32 = arith.constant 0 : i32
    %c0_i32_0 = arith.constant 0 : i32
    return %c0_i32, %arg0 : i32, i32
  }
}

</mosaic_0001>

<bundles_post_ra>
// kernel: tpu_custom_call.1
= control target key start
LH: loop header
LB: loop body
LE: loop exit
PB: predicated region body
PF: predicated region fallthrough
CT: control target
= control target key end

     0   :  { %s1799_s0 = inlined_call_operand.vmem [shape: bf16[8,2048], index: 0, kind: input, shape index: {}]   ;;  %s1800_s1 = inlined_call_operand.vmem [shape: bf16[32,8], index: 1, kind: input, shape index: {}]   ;;  %s1801_s2 = inlined_call_operand.vmem [shape: f32[32,1], index: 2, kind: input, shape index: {}]   ;;  %s1802_s3 = inlined_call_operand.vmem [shape: bf16[32,32], index: 3, kind: input, shape index: {}]   ;;  %s1803_s4 = inlined_call_operand.vmem [shape: f32[32,1], index: 4, kind: input, shape index: {}]   ;;  %s1804_s5 = inlined_call_operand.vmem [shape: bf16[16,32], index: 5, kind: input, shape index: {}]   ;;  %s1805_s6 = inlined_call_operand.vmem [shape: f32[16,1], index: 6, kind: input, shape index: {}]   ;;  %s1806_s7 = inlined_call_operand.vmem [shape: f32[16,1], index: 7, kind: input, shape index: {}]   ;;  %s1807_s8 = inlined_call_operand.<no memory space> [shape: f32[1,1], index: 8, kind: input, shape index: {}]   ;;  %s1808_s9 = inlined_call_operand.hbm [shape: f32[1,2048], index: 9, kind: output, shape index: {}]  }
   0x1   :  { %v14_v0 = vstv %s1807_s8 }
   0x2   :  { %15 = vst [vmem:[#allocation2] sm:$0x1] %v14_v0 }
   0x3   :  { %16 = vsyncpa [#allocation4], 0 }
   0x4   :  { %18 = vsyncpa [#allocation4 + $0x1], 0  ;;  %s1467_s11 = smov 0   ;;  %s1469_s12 = smov 0  }
   0x5   :  { %s1471_s13 = smov 0   ;;  %s1473_s14 = smov 0  }
   0x6 LB: > { %s1229_s8 = sadd.s32 4294967295, %s1411_s14   ;;  %s1230_s15 = sadd.s32 4294967294, %s1411_s14   ;;  %s1411_s14 = sphi %s1473_s14, %s1814_s14   ;;  %s1407_s13 = sphi %s1471_s13, %s1813_s13   ;;  %s1403_s12 = sphi %s1469_s12, %s1812_s12   ;;  %s1399_s11 = sphi %s1467_s11, %s1811_s11  }
   0x7   : > { %s1490_s16 = sadd.s32 1, %s1411_s14   ;;  %s225_s17 = sadd.s32 1, %s1407_s13 }
   0x8   : > { %s222_s18 = ssub.s32 %s1411_s14, %s1490_s16  ;;  %p235_p0 = scmp.ne.s32.totalorder %s1407_s13, %s1403_s12 }
   0x9   : > { %p223_p1 = scmp.eq.s32.totalorder %s222_s18, 0  ;;  %p236_p2 = scmp.eq.s32.totalorder %s1229_s8, 1 }
   0xa   : > { %p241_p3 = scmp.ne.s32.totalorder %s1403_s12, %s1399_s11  ;;  %p242_p4 = scmp.eq.s32.totalorder %s1230_s15, 1 }
   0xb   : > { %s1500_s19 = scalar_select %p223_p1, %s1407_s13, %s225_s17  }
   0xc   : > { %p1502_p5 = por %p236_p2, %p235_p0  ;;  %p1506_p6 = por %p242_p4, %p241_p3 }
   0xd   : > { %p1233_p7 = scmp.ge.s32.totalorder %s1411_s14, 1  ;;  %p293_p8 = scmp.lt.s32.totalorder %s1411_s14, 3 }
   0xf   : > { %p294_p9 = pnand %p1233_p7, %p293_p8 }
  0x10   : > { %s1512_s22 = sshll.u32 (!%p294_p9), %s1229_s8, 3  ;;  %s326_s23 = sand.u32 (!%p294_p9), 1, %s1403_s12  }
  0x11   : > { %297 = sbr.rel (%p294_p9) target bundleno = 577 (0x241), region = 56  ;;  %p330_p10 = scmp.lt.s32.totalorder (!%p294_p9), %s1512_s22, 15 }
  0x12   : > { %s1761_s24 = sshll.u32 (!%p294_p9), %s326_s23, 3  ;;  %s1369_s18 = scalar_lea.hbm (!%p294_p9), %s1808_s9, 16 }
  0x16   : > { %v347_v1 = vld [vmem:[%s1801_s2 + $0x10] sm:$0xff]  ;;  %v1413_v2 = vmov 0   ;;  %v345_v3 = vld [vmem:[%s1801_s2] sm:$0xff]  ;;  %s331_s27 = scalar_select %p330_p10, %s1512_s22, 15  ;;  %v348_v4 = vld [vmem:[%s1801_s2 + $0x18] sm:$0xff]  ;;  %vm418_vm0 = vcmask 1043456  }
  0x17   : > { %1346 = vset.pattern.permute.xlu0 %v1413_v2  ;;  %1347 = vset.pattern.permute.xlu1 %v1413_v2  ;;  %v346_v12 = vld [vmem:[%s1801_s2 + $0x8] sm:$0xff]  ;;  %v1301_v30 = vld [vmem:[%s1800_s1] sm:$0xff]  ;;  %vm411_vm1 = vcmask 64512   ;;  %vm673_vm2 = vcmask 261120   ;;  %vm1140_vm3 = vcmask 1040384   ;;  %vm1142_vm4 = vcmask 1042434  }
  0x18   : > { %373 = vperm.xlu0 %1346, %v347_v1   ;;  %1348 = vset.pattern.permute.xlu2 %v1413_v2  ;;  %s1236_s28 = sshll.u32 %s331_s27, 2  ;;  %v353_v33 = vld [vmem:[%s1803_s4] sm:$0xff]  ;;  %v354_v36 = vld [vmem:[%s1803_s4 + $0x8] sm:$0xff]  ;;  %s1166_s27 = scalar_lea.hbm %s1808_s9, %s1512_s22  ;;  %vm1144_vm5 = vcmask 1041408   ;;  %vm1146_vm6 = vcmask 1044484   ;;  %vm1148_vm7 = vcmask 1046534  }
  0x19   : > { %363 = vperm.xlu1 %1347, %v345_v3   ;;  %s333_s10 = scalar_lea.vmem %s1799_s0, %s1236_s28  ;;  %v360_v37 = vld [vmem:[%s1805_s6 + $0x8] sm:$0xff]  ;;  %v1026_v38 = vld [vmem:[%s1806_s7] sm:$0xff]  ;;  %vm1150_vm8 = vcmask 1045508   ;;  %s328_s28 = scalar_lea.vmem [#allocation3], %s1761_s24 }
  0x1a   : > { %v337_v5 = vld [vmem:[%s333_s10] sm:$0xff]  ;;  %v338_v6 = vld [vmem:[%s333_s10 + $0x8] sm:$0xff]  ;;  %v340_v7 = vld [vmem:[%s333_s10 + $0x18] sm:$0xff]  ;;  %s1168_s29 = sshll.u32 %s328_s28, 4  ;;  %s1170_s30 = sshll.u32 %s1166_s27, 4  ;;  %s1169_s29 = int_to_ptr.vmem [resolvable:$true] %s1168_s29  ;;  %s1171_s30 = int_to_ptr.hbm [resolvable:$true] %s1170_s30 }
  0x1b   : > { %v395_v8 = vunpack.c.l.b16 %v337_v5  ;;  %v396_v9 = vunpack.c.h.b16 %v337_v5  ;;  %v397_v10 = vunpack.c.l.b16 %v338_v6  ;;  %v398_v11 = vunpack.c.h.b16 %v338_v6  ;;  %v339_v13 = vld [vmem:[%s333_s10 + $0x10] sm:$0xff]  ;;  %v1302_v39 = vld [vmem:[%s1800_s1 + $0x8] sm:$0xff]  ;;  %v1110_v40 = vld [vmem:[#allocation2] sm:$0x1]  ;;  %s1156_s22 = scalar_lea.sflag [#allocation4], %s326_s23  ;;  %s1363_s10 = sshra.s32 %s1171_s30, 4  ;;  %s1364_s10 = int_to_ptr.hbm [resolvable:$true] %s1363_s10 }
  0x1c   : > { %v401_v14 = vunpack.c.l.b16 %v340_v7  ;;  %v402_v15 = vunpack.c.h.b16 %v340_v7  ;;  %v399_v16 = vunpack.c.l.b16 %v339_v13  ;;  %v400_v17 = vunpack.c.h.b16 %v339_v13  ;;  %s1365_s8 = scalar_lea.hbm %s1364_s10, 8  ;;  %p1370_p0 = scmp.lt.s32.totalorder %s1364_s10, %s1808_s9 }
  0x1d   : > { %v403_v18 = vpack.c.b16 %v395_v8, %v395_v8  ;;  %v404_v19 = vpack.c.b16 %v396_v9, %v396_v9  ;;  %v405_v20 = vpack.c.b16 %v397_v10, %v397_v10  ;;  %v406_v21 = vpack.c.b16 %v398_v11, %v398_v11  ;;  %p1366_p11 = scmp.ne.s32.totalorder %s1364_s10, %s1365_s8  ;;  %p1371_p1 = scmp.lt.s32.totalorder %s1369_s18, %s1365_s8 }
  0x1e   : > { %v409_v22 = vpack.c.b16 %v401_v14, %v401_v14  ;;  %v410_v23 = vpack.c.b16 %v402_v15, %v402_v15  ;;  %v407_v24 = vpack.c.b16 %v399_v16, %v399_v16  ;;  %v408_v25 = vpack.c.b16 %v400_v17, %v400_v17 }
  0x1f   : > { %v420_v26 = vsel %vm418_vm0, %v403_v18, 0  ;;  %v423_v27 = vsel %vm418_vm0, %v404_v19, 0  ;;  %v426_v28 = vsel %vm418_vm0, %v405_v20, 0  ;;  %v429_v29 = vsel %vm418_vm0, %v406_v21, 0  ;;  %p1367_p12 = pnand %p1366_p11, %p1502_p5  ;;  %p1372_p2 = por %p1371_p1, %p1370_p0 }
  0x20   : > { %378 = vperm.xlu0 %1346, %v348_v4   ;;  %450 = vmatpush.bf16.msra.mxu0 %v420_v26  ;;  %v438_v31 = vsel %vm418_vm0, %v409_v22, 0  ;;  %v441_v32 = vsel %vm418_vm0, %v410_v23, 0  ;;  %v432_v34 = vsel %vm418_vm0, %v407_v24, 0  ;;  %v435_v35 = vsel %vm418_vm0, %v408_v25, 0 }
  0x21   : > { %368 = vperm.xlu1 %1347, %v346_v12   ;;  %469 = vmatpush.bf16.msra.mxu1 %v423_v27  ;;  %p1368_p13 = pneg %p1367_p12 }
  0x22   : > { %488 = vmatpush.bf16.msra.mxu2 %v426_v28  ;;  %507 = vmatpush.bf16.msra.mxu3 %v429_v29 }
  0x23   : > { %1245 = vmatmul.msk.bf16.vlgmr.msra.gmra.mxu0 %vm411_vm1, %v1301_v30  ;;  %p1373_p3 = pnand %p1372_p2, %p1368_p13 }
  0x24   : > { %1247 = vmatmul.msk.bf16.vlgmr.msra.gmra.mxu1 %vm411_vm1, %v1301_v30  ;;  %526 = vmatpush.bf16.msrb.mxu0 %v432_v34 }
  0x25   : > { %1249 = vmatmul.msk.bf16.vlgmr.msra.gmra.mxu2 %vm411_vm1, %v1301_v30  ;;  %1251 = vmatmul.msk.bf16.vlgmr.msra.gmra.mxu3 %vm411_vm1, %v1301_v30 }
  0x26   : > { %564 = vmatpush.bf16.msrb.mxu2 %v438_v31  ;;  %583 = vmatpush.bf16.msrb.mxu3 %v441_v32  ;;  %v1600_v31 = vld [vmem:[%s1802_s3] sm:$0xff] }
  0x27   : > { %545 = vmatpush.bf16.msrb.mxu1 %v435_v35 }
  0x28   : > { %645 = vperm.xlu0 %1346, %v353_v33  }
  0x29   : > { %650 = vperm.xlu1 %1347, %v354_v36  }
  0x30   : > { %887 = vperm.xlu0 %1346, %v360_v37  }
  0x31   : > { %1030 = vperm.xlu1 %1347, %v1026_v38  }
  0x33   : > { %1246 = vmatmul.msk.bf16.gmra.mxu0 %vm411_vm1, %v1302_v39 }
  0x34   : > { %1248 = vmatmul.msk.bf16.gmra.mxu1 %vm411_vm1, %v1302_v39 }
  0x35   : > { %1250 = vmatmul.msk.bf16.gmra.mxu2 %vm411_vm1, %v1302_v39  ;;  %1252 = vmatmul.msk.bf16.gmra.mxu3 %vm411_vm1, %v1302_v39 }
  0x38   : > { %1113 = vperm.xlu0 %1346, %v1110_v40  }
  0x43   : > { %1253 = vmatmul.msk.bf16.vlgmr.msrb.gmra.mxu0 %vm411_vm1, %v1301_v30 }
  0x44   : > { %1255 = vmatmul.msk.bf16.vlgmr.msrb.gmra.mxu1 %vm411_vm1, %v1301_v30 }
  0x45   : > { %1257 = vmatmul.msk.bf16.vlgmr.msrb.gmra.mxu2 %vm411_vm1, %v1301_v30  ;;  %1259 = vmatmul.msk.bf16.vlgmr.msrb.gmra.mxu3 %vm411_vm1, %v1301_v30 }
  0x53   : > { %1254 = vmatmul.msk.bf16.gmra.mxu0 %vm411_vm1, %v1302_v39 }
  0x54   : > { %1256 = vmatmul.msk.bf16.gmra.mxu1 %vm411_vm1, %v1302_v39 }
  0x55   : > { %1258 = vmatmul.msk.bf16.gmra.mxu2 %vm411_vm1, %v1302_v39  ;;  %1260 = vmatmul.msk.bf16.gmra.mxu3 %vm411_vm1, %v1302_v39 }
  0x8a   : > { %v1573_v47 = vpop.permute.xlu0 %373 }
  0x8b   : > { %v1575_v48 = vpop.permute.xlu1 %363 }
  0x92   : > { %v1577_v53 = vpop.permute.xlu0 %378 }
  0x93   : > { %v1579_v54 = vpop.permute.xlu1 %368 }
  0xa0   : > { %v452_v41 = vpop.f32.mrf.mxu0 }
  0xa1   : > { %v471_v42 = vpop.f32.mrf.mxu1  ;;  %v453_v61 = vadd.f32 %v452_v41, %v1575_v48 }
  0xa2   : > { %v472_v62 = vadd.f32 %v471_v42, %v1575_v48 }
  0xa3   : > { %v595_v7 = vmax.f32 %v453_v61, 0.0 }
  0xa4   : > { %v596_v8 = vmax.f32 %v472_v62, 0.0 }
  0xa8   : > { %v490_v43 = vpop.f32.mrf.mxu2  ;;  %v509_v44 = vpop.f32.mrf.mxu3 }
  0xa9   : > { %v454_v45 = vpop.f32.mrf.mxu0  ;;  %v473_v46 = vpop.f32.mrf.mxu1  ;;  %v491_v23 = vadd.f32 %v490_v43, %v1575_v48  ;;  %v510_v24 = vadd.f32 %v509_v44, %v1575_v48 }
  0xaa   : > { %v455_v1 = vadd.f32 %v454_v45, %v1579_v54  ;;  %v474_v2 = vadd.f32 %v473_v46, %v1579_v54 }
  0xab   : > { %v597_v36 = vmax.f32 %v491_v23, 0.0  ;;  %v598_v37 = vmax.f32 %v510_v24, 0.0 }
  0xac   : > { %v603_v11 = vmax.f32 %v455_v1, 0.0  ;;  %v604_v12 = vmax.f32 %v474_v2, 0.0 }
  0xae   : > { %v627_v25 = vpack.c.bf16 %v603_v11, %v595_v7  ;;  %v628_v26 = vpack.c.bf16 %v604_v12, %v596_v8 }
  0xb0   : > { %v492_v49 = vpop.f32.mrf.mxu2  ;;  %v511_v50 = vpop.f32.mrf.mxu3 }
  0xb1   : > { %v457_v51 = vpop.f32.mrf.mxu0  ;;  %v476_v52 = vpop.f32.mrf.mxu1  ;;  %v493_v17 = vadd.f32 %v492_v49, %v1579_v54  ;;  %v512_v18 = vadd.f32 %v511_v50, %v1579_v54  ;;  %v1613_v50 = vld [vmem:[%s1802_s3 + $0x8] sm:$0xff] }
  0xb2   : > { %v458_v55 = vadd.f32 %v457_v51, %v1573_v47  ;;  %v477_v56 = vadd.f32 %v476_v52, %v1573_v47 }
  0xb3   : > { %v605_v32 = vmax.f32 %v493_v17, 0.0  ;;  %v606_v33 = vmax.f32 %v512_v18, 0.0 }
  0xb4   : > { %v611_v3 = vmax.f32 %v458_v55, 0.0  ;;  %v612_v4 = vmax.f32 %v477_v56, 0.0 }
  0xb5   : > { %v629_v40 = vpack.c.bf16 %v605_v32, %v597_v36  ;;  %v630_v41 = vpack.c.bf16 %v606_v33, %v598_v37 }
  0xb8   : > { %v495_v57 = vpop.f32.mrf.mxu2  ;;  %v514_v58 = vpop.f32.mrf.mxu3 }
  0xb9   : > { %v459_v59 = vpop.f32.mrf.mxu0  ;;  %v478_v60 = vpop.f32.mrf.mxu1  ;;  %v496_v13 = vadd.f32 %v495_v57, %v1573_v47  ;;  %v515_v14 = vadd.f32 %v514_v58, %v1573_v47  ;;  %v355_v57 = vld [vmem:[%s1803_s4 + $0x10] sm:$0xff] }
  0xba   : > { %v460_v63 = vadd.f32 %v459_v59, %v1577_v53  ;;  %v479_v0 = vadd.f32 %v478_v60, %v1577_v53  ;;  %655 = vperm.xlu2 %1348, %v355_v57  }
  0xbb   : > { %v613_v27 = vmax.f32 %v496_v13, 0.0  ;;  %v614_v28 = vmax.f32 %v515_v14, 0.0 }
  0xbc   : > { %v619_v5 = vmax.f32 %v460_v63, 0.0  ;;  %v620_v6 = vmax.f32 %v479_v0, 0.0 }
  0xbe   : > { %v635_v9 = vpack.c.bf16 %v619_v5, %v611_v3  ;;  %v636_v10 = vpack.c.bf16 %v620_v6, %v612_v4 }
  0xc0   : > { %v497_v15 = vpop.f32.mrf.mxu2  ;;  %v516_v16 = vpop.f32.mrf.mxu3  ;;  %686 = vmatpush.bf16.msra.mxu0 %v635_v9  ;;  %705 = vmatpush.bf16.msra.mxu1 %v636_v10  ;;  %v356_v10 = vld [vmem:[%s1803_s4 + $0x18] sm:$0xff] }
  0xc1   : > { %v498_v19 = vadd.f32 %v497_v15, %v1577_v53  ;;  %v517_v20 = vadd.f32 %v516_v16, %v1577_v53  ;;  %v528_v21 = vpop.f32.mrf.mxu0  ;;  %v547_v22 = vpop.f32.mrf.mxu1 }
  0xc2   : > { %v529_v0 = vadd.f32 %v528_v21, %v1575_v48  ;;  %v548_v1 = vadd.f32 %v547_v22, %v1575_v48  ;;  %660 = vperm.xlu2 %1348, %v356_v10  }
  0xc3   : > { %v621_v29 = vmax.f32 %v498_v19, 0.0  ;;  %v622_v30 = vmax.f32 %v517_v20, 0.0 }
  0xc4   : > { %687 = vmatpush.bf16.msra.mxu0 %v627_v25  ;;  %706 = vmatpush.bf16.msra.mxu1 %v628_v26  ;;  %v599_v13 = vmax.f32 %v529_v0, 0.0  ;;  %v600_v14 = vmax.f32 %v548_v1, 0.0 }
  0xc5   : > { %v637_v34 = vpack.c.bf16 %v621_v29, %v613_v27  ;;  %v638_v35 = vpack.c.bf16 %v622_v30, %v614_v28 }
  0xc7   : > { %724 = vmatpush.bf16.msra.mxu2 %v637_v34  ;;  %743 = vmatpush.bf16.msra.mxu3 %v638_v35  ;;  %v1027_v35 = vld [vmem:[%s1806_s7 + $0x8] sm:$0xff] }
  0xc8   : > { %v566_v38 = vpop.f32.mrf.mxu2  ;;  %v585_v39 = vpop.f32.mrf.mxu3  ;;  %1269 = vmatmul.msk.bf16.vlgmr.msra.gmra.mxu0 %vm673_vm2, %v1600_v31  ;;  %1271 = vmatmul.msk.bf16.vlgmr.msra.gmra.mxu1 %vm673_vm2, %v1600_v31 }
  0xc9   : > { %v530_v42 = vpop.f32.mrf.mxu0  ;;  %v549_v43 = vpop.f32.mrf.mxu1  ;;  %v567_v21 = vadd.f32 %v566_v38, %v1575_v48  ;;  %v586_v22 = vadd.f32 %v585_v39, %v1575_v48 }
  0xca   : > { %v531_v60 = vadd.f32 %v530_v42, %v1579_v54  ;;  %v550_v61 = vadd.f32 %v549_v43, %v1579_v54 }
  0xcb   : > { %725 = vmatpush.bf16.msra.mxu2 %v629_v40  ;;  %744 = vmatpush.bf16.msra.mxu3 %v630_v41  ;;  %v601_v32 = vmax.f32 %v567_v21, 0.0  ;;  %v602_v33 = vmax.f32 %v586_v22, 0.0 }
  0xcc   : > { %v607_v6 = vmax.f32 %v531_v60, 0.0  ;;  %v608_v7 = vmax.f32 %v550_v61, 0.0 }
  0xce   : > { %1273 = vmatmul.msk.bf16.vlgmr.msra.gmra.mxu2 %vm673_vm2, %v1600_v31  ;;  %1275 = vmatmul.msk.bf16.vlgmr.msra.gmra.mxu3 %vm673_vm2, %v1600_v31  ;;  %v632_v23 = vpack.c.bf16 %v608_v7, %v600_v14 }
  0xd0   : > { %v568_v44 = vpop.f32.mrf.mxu2  ;;  %v587_v45 = vpop.f32.mrf.mxu3 }
  0xd1   : > { %v533_v46 = vpop.f32.mrf.mxu0  ;;  %v552_v49 = vpop.f32.mrf.mxu1  ;;  %v569_v17 = vadd.f32 %v568_v44, %v1579_v54  ;;  %v588_v18 = vadd.f32 %v587_v45, %v1579_v54 }
  0xd2   : > { %v534_v51 = vadd.f32 %v533_v46, %v1573_v47  ;;  %v553_v52 = vadd.f32 %v552_v49, %v1573_v47 }
  0xd3   : > { %v609_v28 = vmax.f32 %v569_v17, 0.0  ;;  %v610_v29 = vmax.f32 %v588_v18, 0.0 }
  0xd4   : > { %v615_v2 = vmax.f32 %v534_v51, 0.0  ;;  %v616_v3 = vmax.f32 %v553_v52, 0.0  ;;  %v1673_v52 = vpop.permute.xlu1 %650 }
  0xd5   : > { %v633_v48 = vpack.c.bf16 %v609_v28, %v601_v32  ;;  %v634_v34 = vpack.c.bf16 %v610_v29, %v602_v33 }
  0xd8   : > { %v571_v55 = vpop.f32.mrf.mxu2  ;;  %v590_v56 = vpop.f32.mrf.mxu3  ;;  %1270 = vmatmul.msk.bf16.gmra.mxu0 %vm673_vm2, %v1613_v50  ;;  %1272 = vmatmul.msk.bf16.gmra.mxu1 %vm673_vm2, %v1613_v50 }
  0xd9   : > { %v535_v58 = vpop.f32.mrf.mxu0  ;;  %v554_v59 = vpop.f32.mrf.mxu1  ;;  %v572_v11 = vadd.f32 %v571_v55, %v1573_v47  ;;  %v591_v12 = vadd.f32 %v590_v56, %v1573_v47  ;;  %v631_v47 = vpack.c.bf16 %v607_v6, %v599_v13 }
  0xda   : > { %v536_v62 = vadd.f32 %v535_v58, %v1577_v53  ;;  %v555_v63 = vadd.f32 %v554_v59, %v1577_v53 }
  0xdb   : > { %v617_v24 = vmax.f32 %v572_v11, 0.0  ;;  %v618_v25 = vmax.f32 %v591_v12, 0.0 }
  0xdc   : > { %v623_v4 = vmax.f32 %v536_v62, 0.0  ;;  %v624_v5 = vmax.f32 %v555_v63, 0.0  ;;  %v1679_v62 = vpop.permute.xlu0 %645 }
  0xde   : > { %v639_v8 = vpack.c.bf16 %v623_v4, %v615_v2  ;;  %v640_v9 = vpack.c.bf16 %v624_v5, %v616_v3  ;;  %1274 = vmatmul.msk.bf16.gmra.mxu2 %vm673_vm2, %v1613_v50  ;;  %1276 = vmatmul.msk.bf16.gmra.mxu3 %vm673_vm2, %v1613_v50 }
  0xe0   : > { %v573_v15 = vpop.f32.mrf.mxu2  ;;  %v592_v16 = vpop.f32.mrf.mxu3  ;;  %762 = vmatpush.bf16.msrb.mxu0 %v639_v8  ;;  %781 = vmatpush.bf16.msrb.mxu1 %v640_v9 }
  0xe1   : > { %v574_v19 = vadd.f32 %v573_v15, %v1577_v53  ;;  %v593_v20 = vadd.f32 %v592_v16, %v1577_v53  ;;  %v359_v53 = vld [vmem:[%s1805_s6] sm:$0xff] }
  0xe2   : > { %882 = vperm.xlu2 %1348, %v359_v53   ;;  %v1686_v15 = vld [vmem:[%s1804_s5] sm:$0xff] }
  0xe3   : > { %v625_v26 = vmax.f32 %v574_v19, 0.0  ;;  %v626_v27 = vmax.f32 %v593_v20, 0.0 }
  0xe4   : > { %763 = vmatpush.bf16.msrb.mxu0 %v631_v47  ;;  %782 = vmatpush.bf16.msrb.mxu1 %v632_v23 }
  0xe5   : > { %v641_v54 = vpack.c.bf16 %v625_v26, %v617_v24  ;;  %v642_v30 = vpack.c.bf16 %v626_v27, %v618_v25 }
  0xe7   : > { %800 = vmatpush.bf16.msrb.mxu2 %v641_v54  ;;  %819 = vmatpush.bf16.msrb.mxu3 %v642_v30 }
  0xe8   : > { %1277 = vmatmul.msk.bf16.vlgmr.msrb.gmra.mxu0 %vm673_vm2, %v1600_v31  ;;  %1279 = vmatmul.msk.bf16.vlgmr.msrb.gmra.mxu1 %vm673_vm2, %v1600_v31 }
  0xea   : > { %1035 = vperm.xlu2 %1348, %v1027_v35  }
  0xeb   : > { %801 = vmatpush.bf16.msrb.mxu2 %v633_v48  ;;  %820 = vmatpush.bf16.msrb.mxu3 %v634_v34 }
  0xee   : > { %1281 = vmatmul.msk.bf16.vlgmr.msrb.gmra.mxu2 %vm673_vm2, %v1600_v31  ;;  %1283 = vmatmul.msk.bf16.vlgmr.msrb.gmra.mxu3 %vm673_vm2, %v1600_v31 }
  0xf8   : > { %1278 = vmatmul.msk.bf16.gmra.mxu0 %vm673_vm2, %v1613_v50  ;;  %1280 = vmatmul.msk.bf16.gmra.mxu1 %vm673_vm2, %v1613_v50 }
  0xfe   : > { %1282 = vmatmul.msk.bf16.gmra.mxu2 %vm673_vm2, %v1613_v50  ;;  %1284 = vmatmul.msk.bf16.gmra.mxu3 %vm673_vm2, %v1613_v50 }
 0x114   : > { %v1667_v39 = vpop.permute.xlu2 %655 }
 0x11c   : > { %v1671_v51 = vpop.permute.xlu2 %660 }
 0x145   : > { %v689_v36 = vpop.f32.mrf.mxu0  ;;  %v708_v37 = vpop.f32.mrf.mxu1 }
 0x146   : > { %v690_v63 = vadd.f32 %v689_v36, %v1679_v62  ;;  %v709_v0 = vadd.f32 %v708_v37, %v1679_v62 }
 0x148   : > { %v832_v9 = vmax.f32 %v690_v63, 0.0  ;;  %v833_v10 = vmax.f32 %v709_v0, 0.0 }
 0x14d   : > { %v691_v31 = vpop.f32.mrf.mxu0  ;;  %v710_v38 = vpop.f32.mrf.mxu1 }
 0x14e   : > { %v692_v50 = vadd.f32 %v691_v31, %v1673_v52  ;;  %v711_v55 = vadd.f32 %v710_v38, %v1673_v52 }
 0x150   : > { %v840_v5 = vmax.f32 %v692_v50, 0.0  ;;  %v841_v6 = vmax.f32 %v711_v55, 0.0 }
 0x151   : > { %v727_v40 = vpop.f32.mrf.mxu2  ;;  %v746_v41 = vpop.f32.mrf.mxu3 }
 0x152   : > { %v864_v13 = vpack.c.bf16 %v840_v5, %v832_v9  ;;  %v865_v14 = vpack.c.bf16 %v841_v6, %v833_v10  ;;  %v728_v23 = vadd.f32 %v727_v40, %v1679_v62  ;;  %v747_v24 = vadd.f32 %v746_v41, %v1679_v62 }
 0x154   : > { %v834_v48 = vmax.f32 %v728_v23, 0.0  ;;  %v835_v34 = vmax.f32 %v747_v24, 0.0 }
 0x155   : > { %v694_v42 = vpop.f32.mrf.mxu0  ;;  %v713_v43 = vpop.f32.mrf.mxu1 }
 0x156   : > { %v695_v46 = vadd.f32 %v694_v42, %v1667_v39  ;;  %v714_v49 = vadd.f32 %v713_v43, %v1667_v39 }
 0x158   : > { %v848_v58 = vmax.f32 %v695_v46, 0.0  ;;  %v849_v59 = vmax.f32 %v714_v49, 0.0 }
 0x159   : > { %v729_v44 = vpop.f32.mrf.mxu2  ;;  %v748_v45 = vpop.f32.mrf.mxu3 }
 0x15a   : > { %v730_v20 = vadd.f32 %v729_v44, %v1673_v52  ;;  %v749_v21 = vadd.f32 %v748_v45, %v1673_v52 }
 0x15c   : > { %v842_v30 = vmax.f32 %v730_v20, 0.0  ;;  %v843_v53 = vmax.f32 %v749_v21, 0.0 }
 0x15d   : > { %v696_v56 = vpop.f32.mrf.mxu0  ;;  %v715_v57 = vpop.f32.mrf.mxu1 }
 0x15e   : > { %v697_v60 = vadd.f32 %v696_v56, %v1671_v51  ;;  %v716_v61 = vadd.f32 %v715_v57, %v1671_v51  ;;  %v866_v37 = vpack.c.bf16 %v842_v30, %v834_v48  ;;  %v867_v31 = vpack.c.bf16 %v843_v53, %v835_v34 }
 0x160   : > { %v856_v1 = vmax.f32 %v697_v60, 0.0  ;;  %v857_v2 = vmax.f32 %v716_v61, 0.0 }
 0x161   : > { %v732_v3 = vpop.f32.mrf.mxu2  ;;  %v751_v4 = vpop.f32.mrf.mxu3 }
 0x162   : > { %v872_v7 = vpack.c.bf16 %v856_v1, %v848_v58  ;;  %v873_v8 = vpack.c.bf16 %v857_v2, %v849_v59  ;;  %v733_v16 = vadd.f32 %v732_v3, %v1667_v39  ;;  %v752_v17 = vadd.f32 %v751_v4, %v1667_v39 }
 0x164   : > { %904 = vmatpush.bf16.msra.mxu0 %v872_v7  ;;  %918 = vmatpush.bf16.msra.mxu1 %v873_v8  ;;  %v850_v25 = vmax.f32 %v733_v16, 0.0  ;;  %v851_v26 = vmax.f32 %v752_v17, 0.0 }
 0x165   : > { %v765_v11 = vpop.f32.mrf.mxu0  ;;  %v784_v12 = vpop.f32.mrf.mxu1 }
 0x166   : > { %v766_v57 = vadd.f32 %v765_v11, %v1679_v62  ;;  %v785_v58 = vadd.f32 %v784_v12, %v1679_v62 }
 0x168   : > { %905 = vmatpush.bf16.msra.mxu0 %v864_v13  ;;  %919 = vmatpush.bf16.msra.mxu1 %v865_v14  ;;  %v836_v6 = vmax.f32 %v766_v57, 0.0  ;;  %v837_v7 = vmax.f32 %v785_v58, 0.0 }
 0x169   : > { %v734_v18 = vpop.f32.mrf.mxu2  ;;  %v753_v19 = vpop.f32.mrf.mxu3 }
 0x16a   : > { %v735_v22 = vadd.f32 %v734_v18, %v1671_v51  ;;  %v754_v47 = vadd.f32 %v753_v19, %v1671_v51 }
 0x16b   : > { %1289 = vmatmul.msk.bf16.vlgmr.msra.gmra.mxu0 %vm673_vm2, %v1686_v15  ;;  %1290 = vmatmul.msk.bf16.vlgmr.msra.gmra.mxu1 %vm673_vm2, %v1686_v15 }
 0x16c   : > { %v858_v27 = vmax.f32 %v735_v22, 0.0  ;;  %v859_v28 = vmax.f32 %v754_v47, 0.0 }
 0x16d   : > { %v767_v29 = vpop.f32.mrf.mxu0  ;;  %v786_v54 = vpop.f32.mrf.mxu1 }
 0x16e   : > { %v874_v32 = vpack.c.bf16 %v858_v27, %v850_v25  ;;  %v875_v33 = vpack.c.bf16 %v859_v28, %v851_v26  ;;  %v768_v49 = vadd.f32 %v767_v29, %v1673_v52  ;;  %v787_v50 = vadd.f32 %v786_v54, %v1673_v52 }
 0x170   : > { %932 = vmatpush.bf16.msra.mxu2 %v874_v32  ;;  %946 = vmatpush.bf16.msra.mxu3 %v875_v33  ;;  %v844_v2 = vmax.f32 %v768_v49, 0.0  ;;  %v845_v3 = vmax.f32 %v787_v50, 0.0  ;;  %v1728_v33 = vpop.permute.xlu2 %882 }
 0x171   : > { %v803_v35 = vpop.f32.mrf.mxu2  ;;  %v822_v36 = vpop.f32.mrf.mxu3 }
 0x172   : > { %v868_v8 = vpack.c.bf16 %v844_v2, %v836_v6  ;;  %v869_v9 = vpack.c.bf16 %v845_v3, %v837_v7  ;;  %v804_v19 = vadd.f32 %v803_v35, %v1679_v62  ;;  %v823_v20 = vadd.f32 %v822_v36, %v1679_v62  ;;  %v1730_v35 = vpop.permute.xlu0 %887 }
 0x174   : > { %933 = vmatpush.bf16.msra.mxu2 %v866_v37  ;;  %947 = vmatpush.bf16.msra.mxu3 %v867_v31  ;;  %v838_v26 = vmax.f32 %v804_v19, 0.0 }
 0x175   : > { %v770_v38 = vpop.f32.mrf.mxu0  ;;  %v789_v40 = vpop.f32.mrf.mxu1 }
 0x176   : > { %v771_v43 = vadd.f32 %v770_v38, %v1667_v39  ;;  %v790_v44 = vadd.f32 %v789_v40, %v1667_v39 }
 0x177   : > { %1291 = vmatmul.msk.bf16.vlgmr.msra.gmra.mxu2 %vm673_vm2, %v1686_v15  ;;  %1292 = vmatmul.msk.bf16.vlgmr.msra.gmra.mxu3 %vm673_vm2, %v1686_v15 }
 0x178   : > { %v852_v59 = vmax.f32 %v771_v43, 0.0  ;;  %v853_v60 = vmax.f32 %v790_v44, 0.0 }
 0x179   : > { %v805_v41 = vpop.f32.mrf.mxu2  ;;  %v824_v42 = vpop.f32.mrf.mxu3 }
 0x17a   : > { %v806_v14 = vadd.f32 %v805_v41, %v1673_v52  ;;  %v825_v16 = vadd.f32 %v824_v42, %v1673_v52 }
 0x17c   : > { %v846_v23 = vmax.f32 %v806_v14, 0.0  ;;  %v847_v52 = vmax.f32 %v825_v16, 0.0 }
 0x17d   : > { %v772_v45 = vpop.f32.mrf.mxu0  ;;  %v791_v46 = vpop.f32.mrf.mxu1 }
 0x17e   : > { %v773_v55 = vadd.f32 %v772_v45, %v1671_v51  ;;  %v792_v56 = vadd.f32 %v791_v46, %v1671_v51  ;;  %v870_v27 = vpack.c.bf16 %v846_v23, %v838_v26 }
 0x180   : > { %v860_v61 = vmax.f32 %v773_v55, 0.0  ;;  %v861_v63 = vmax.f32 %v792_v56, 0.0  ;;  %v1740_v56 = vpop.permute.xlu2 %1035 }
 0x181   : > { %v808_v0 = vpop.f32.mrf.mxu2  ;;  %v827_v1 = vpop.f32.mrf.mxu3 }
 0x182   : > { %v876_v4 = vpack.c.bf16 %v860_v61, %v852_v59  ;;  %v877_v5 = vpack.c.bf16 %v861_v63, %v853_v60  ;;  %v809_v10 = vadd.f32 %v808_v0, %v1667_v39  ;;  %v828_v11 = vadd.f32 %v827_v1, %v1667_v39  ;;  %v1031_v0 = vpop.permute.xlu1 %1030 }
 0x184   : > { %960 = vmatpush.bf16.msrb.mxu0 %v876_v4  ;;  %974 = vmatpush.bf16.msrb.mxu1 %v877_v5  ;;  %v854_v39 = vmax.f32 %v809_v10, 0.0  ;;  %v855_v21 = vmax.f32 %v828_v11, 0.0 }
 0x188   : > { %961 = vmatpush.bf16.msrb.mxu0 %v868_v8  ;;  %975 = vmatpush.bf16.msrb.mxu1 %v869_v9 }
 0x189   : > { %v810_v12 = vpop.f32.mrf.mxu2  ;;  %v829_v13 = vpop.f32.mrf.mxu3 }
 0x18a   : > { %v811_v17 = vadd.f32 %v810_v12, %v1671_v51  ;;  %v830_v18 = vadd.f32 %v829_v13, %v1671_v51  ;;  %v839_v51 = vmax.f32 %v823_v20, 0.0 }
 0x18b   : > { %1293 = vmatmul.msk.bf16.vlgmr.msrb.gmra.mxu0 %vm673_vm2, %v1686_v15  ;;  %1294 = vmatmul.msk.bf16.vlgmr.msrb.gmra.mxu1 %vm673_vm2, %v1686_v15 }
 0x18c   : > { %v862_v22 = vmax.f32 %v811_v17, 0.0  ;;  %v863_v47 = vmax.f32 %v830_v18, 0.0  ;;  %v871_v62 = vpack.c.bf16 %v847_v52, %v839_v51 }
 0x18e   : > { %v878_v24 = vpack.c.bf16 %v862_v22, %v854_v39  ;;  %v879_v25 = vpack.c.bf16 %v863_v47, %v855_v21 }
 0x190   : > { %988 = vmatpush.bf16.msrb.mxu2 %v878_v24  ;;  %1002 = vmatpush.bf16.msrb.mxu3 %v879_v25 }
 0x194   : > { %989 = vmatpush.bf16.msrb.mxu2 %v870_v27  ;;  %1003 = vmatpush.bf16.msrb.mxu3 %v871_v62 }
 0x197   : > { %1295 = vmatmul.msk.bf16.vlgmr.msrb.gmra.mxu2 %vm673_vm2, %v1686_v15  ;;  %1296 = vmatmul.msk.bf16.vlgmr.msrb.gmra.mxu3 %vm673_vm2, %v1686_v15 }
 0x1e8   : > { %v907_v28 = vpop.f32.mrf.mxu0  ;;  %v921_v29 = vpop.f32.mrf.mxu1 }
 0x1e9   : > { %v922_v42 = vadd.f32 %v921_v29, %v1728_v33  ;;  %v908_v5 = vadd.f32 %v907_v28, %v1728_v33 }
 0x1eb   : > { %v1011_v57 = vmax.f32 %v922_v42, 0.0  ;;  %v1010_v20 = vmax.f32 %v908_v5, 0.0 }
 0x1ed   : > { %v1039_v11 = vmul.f32 %v1031_v0, %v1011_v57  ;;  %v1038_v24 = vmul.f32 %v1031_v0, %v1010_v20 }
 0x1f0   : > { %v909_v53 = vpop.f32.mrf.mxu0  ;;  %v923_v32 = vpop.f32.mrf.mxu1 }
 0x1f1   : > { %v924_v15 = vadd.f32 %v923_v32, %v1730_v35  ;;  %v910_v58 = vadd.f32 %v909_v53, %v1730_v35 }
 0x1f3   : > { %v1019_v49 = vmax.f32 %v924_v15, 0.0  ;;  %v1018_v12 = vmax.f32 %v910_v58, 0.0 }
 0x1f5   : > { %v1047_v6 = vmul.f32 %v1740_v56, %v1019_v49  ;;  %v1046_v47 = vmul.f32 %v1740_v56, %v1018_v12 }
 0x1f7   : > { %v1061_v39 = vadd.f32 %v1047_v6, %v1039_v11  ;;  %v1054_v28 = vadd.f32 %v1046_v47, %v1038_v24 }
 0x1f9   : > { %v1062_v25 = vrot.slane %v1061_v39, 4 }
 0x1fa   : > { %v935_v54 = vpop.f32.mrf.mxu2  ;;  %v949_v30 = vpop.f32.mrf.mxu3 }
 0x1fb   : > { %v936_v40 = vadd.f32 %v935_v54, %v1728_v33  ;;  %v950_v41 = vadd.f32 %v949_v30, %v1728_v33  ;;  %v1063_v30 = vadd.f32 %v1062_v25, %v1061_v39 }
 0x1fd   : > { %v1012_v50 = vmax.f32 %v936_v40, 0.0  ;;  %v1013_v55 = vmax.f32 %v950_v41, 0.0 }
 0x1ff   : > { %v1040_v7 = vmul.f32 %v1031_v0, %v1012_v50  ;;  %v1041_v8 = vmul.f32 %v1031_v0, %v1013_v55 }
 0x202   : > { %v937_v48 = vpop.f32.mrf.mxu2  ;;  %v951_v34 = vpop.f32.mrf.mxu3 }
 0x203   : > { %v938_v36 = vadd.f32 %v937_v48, %v1730_v35  ;;  %v952_v37 = vadd.f32 %v951_v34, %v1730_v35 }
 0x205   : > { %v1020_v43 = vmax.f32 %v938_v36, 0.0  ;;  %v1021_v44 = vmax.f32 %v952_v37, 0.0  ;;  %v1055_v36 = vrot.slane %v1054_v28, 4 }
 0x207   : > { %v1048_v59 = vmul.f32 %v1740_v56, %v1020_v43  ;;  %v1049_v60 = vmul.f32 %v1740_v56, %v1021_v44  ;;  %v1056_v49 = vadd.f32 %v1055_v36, %v1054_v28 }
 0x208   : > { %v963_v31 = vpop.f32.mrf.mxu0  ;;  %v977_v38 = vpop.f32.mrf.mxu1 }
 0x209   : > { %v964_v45 = vadd.f32 %v963_v31, %v1728_v33  ;;  %v978_v46 = vadd.f32 %v977_v38, %v1728_v33  ;;  %v1068_v13 = vadd.f32 %v1048_v59, %v1040_v7  ;;  %v1075_v14 = vadd.f32 %v1049_v60, %v1041_v8  ;;  %v1114_v8 = vpop.permute.xlu0 %1113 }
 0x20a   : > { %v1064_v38 = vrot.slane %v1063_v30, 2 }
 0x20b   : > { %v1014_v1 = vmax.f32 %v964_v45, 0.0  ;;  %v1015_v2 = vmax.f32 %v978_v46, 0.0  ;;  %v1069_v23 = vrot.slane %v1068_v13, 4  ;;  %v1076_v52 = vrot.slane %v1075_v14, 4 }
 0x20d   : > { %v1042_v16 = vmul.f32 %v1031_v0, %v1014_v1  ;;  %v1043_v17 = vmul.f32 %v1031_v0, %v1015_v2  ;;  %v1070_v29 = vadd.f32 %v1069_v23, %v1068_v13  ;;  %v1077_v54 = vadd.f32 %v1076_v52, %v1075_v14 }
 0x20f   : > { %v1071_v37 = vrot.slane %v1070_v29, 2  ;;  %v1078_v31 = vrot.slane %v1077_v54, 2 }
 0x210   : > { %v965_v61 = vpop.f32.mrf.mxu0  ;;  %v979_v63 = vpop.f32.mrf.mxu1 }
 0x211   : > { %v966_v3 = vadd.f32 %v965_v61, %v1730_v35  ;;  %v980_v4 = vadd.f32 %v979_v63, %v1730_v35  ;;  %v1072_v50 = vadd.f32 %v1071_v37, %v1070_v29  ;;  %v1079_v55 = vadd.f32 %v1078_v31, %v1077_v54 }
 0x213   : > { %v1022_v9 = vmax.f32 %v966_v3, 0.0  ;;  %v1023_v10 = vmax.f32 %v980_v4, 0.0  ;;  %v1057_v3 = vrot.slane %v1056_v49, 2  ;;  %v1073_v4 = vrot.slane %v1072_v50, 1 }
 0x214   : > { %v1080_v5 = vrot.slane %v1079_v55, 1 }
 0x215   : > { %v1050_v18 = vmul.f32 %v1740_v56, %v1022_v9  ;;  %v1051_v19 = vmul.f32 %v1740_v56, %v1023_v10  ;;  %v1058_v13 = vadd.f32 %v1057_v3, %v1056_v49  ;;  %v1074_v14 = vadd.f32 %v1073_v4, %v1072_v50 }
 0x217   : > { %v1082_v21 = vadd.f32 %v1050_v18, %v1042_v16  ;;  %v1089_v22 = vadd.f32 %v1051_v19, %v1043_v17  ;;  %v1081_v16 = vadd.f32 %v1080_v5, %v1079_v55  ;;  %v1116_v18 = vperm.slane %v1114_v8, 0 }
 0x219   : > { %v1083_v26 = vrot.slane %v1082_v21, 4  ;;  %v1090_v51 = vrot.slane %v1089_v22, 4  ;;  %v1119_v47 = vadd.f32 %v1116_v18, %v1074_v14  ;;  %v1120_v23 = vadd.f32 %v1116_v18, %v1081_v16 }
 0x21a   : > { %v991_v27 = vpop.f32.mrf.mxu2  ;;  %v1005_v62 = vpop.f32.mrf.mxu3 }
 0x21b   : > { %v1084_v53 = vadd.f32 %v1083_v26, %v1082_v21  ;;  %v1091_v32 = vadd.f32 %v1090_v51, %v1089_v22  ;;  %v992_v48 = vadd.f32 %v991_v27, %v1728_v33  ;;  %v1006_v34 = vadd.f32 %v1005_v62, %v1728_v33 }
 0x21c   : > { %v1065_v33 = vadd.f32 %v1064_v38, %v1063_v30  ;;  %v1059_v22 = vrot.slane %v1058_v13, 1  ;;  %v1134_v30 = vrot.slane %v1119_v47, 6 }
 0x21d   : > { %v1085_v15 = vrot.slane %v1084_v53, 2  ;;  %v1092_v40 = vrot.slane %v1091_v32, 2  ;;  %v1016_v43 = vmax.f32 %v992_v48, 0.0  ;;  %v1017_v44 = vmax.f32 %v1006_v34, 0.0 }
 0x21e   : > { %v1060_v28 = vadd.f32 %v1059_v22, %v1058_v13 }
 0x21f   : > { %v1086_v59 = vadd.f32 %v1085_v15, %v1084_v53  ;;  %v1093_v60 = vadd.f32 %v1092_v40, %v1091_v32  ;;  %v1044_v61 = vmul.f32 %v1031_v0, %v1016_v43  ;;  %v1045_v63 = vmul.f32 %v1031_v0, %v1017_v44 }
 0x220   : > { %v1135_v53 = vrot.slane %v1120_v23, 5  ;;  %v1117_v31 = vadd.f32 %v1116_v18, %v1060_v28 }
 0x221   : > { %v1087_v9 = vrot.slane %v1086_v59, 1  ;;  %v1094_v10 = vrot.slane %v1093_v60, 1 }
 0x222   : > { %v993_v41 = vpop.f32.mrf.mxu2  ;;  %v1007_v42 = vpop.f32.mrf.mxu3  ;;  %v1143_v40 = vsel %vm1142_vm4, %v1134_v30, %v1135_v53 }
 0x223   : > { %v994_v45 = vadd.f32 %v993_v41, %v1730_v35  ;;  %v1008_v46 = vadd.f32 %v1007_v42, %v1730_v35  ;;  %v1066_v35 = vrot.slane %v1065_v33, 1  ;;  %v1095_v20 = vadd.f32 %v1094_v10, %v1093_v60 }
 0x225   : > { %v1024_v57 = vmax.f32 %v994_v45, 0.0  ;;  %v1025_v58 = vmax.f32 %v1008_v46, 0.0  ;;  %v1067_v19 = vadd.f32 %v1066_v35, %v1065_v33  ;;  %v1122_v51 = vadd.f32 %v1116_v18, %v1095_v20 }
 0x227   : > { %v1052_v1 = vmul.f32 %v1740_v56, %v1024_v57  ;;  %v1053_v2 = vmul.f32 %v1740_v56, %v1025_v58  ;;  %v1088_v56 = vadd.f32 %v1087_v9, %v1086_v59  ;;  %v1118_v25 = vadd.f32 %v1116_v18, %v1067_v19 }
 0x228   : > { %v1137_v37 = vrot.slane %v1122_v51, 3 }
 0x229   : > { %v1096_v6 = vadd.f32 %v1052_v1, %v1044_v61  ;;  %v1103_v7 = vadd.f32 %v1053_v2, %v1045_v63  ;;  %v1121_v26 = vadd.f32 %v1116_v18, %v1088_v56  ;;  %v1133_v32 = vrot.slane %v1118_v25, 7 }
 0x22b   : > { %v1097_v11 = vrot.slane %v1096_v6, 4  ;;  %v1104_v12 = vrot.slane %v1103_v7, 4  ;;  %v1136_v36 = vrot.slane %v1121_v26, 4  ;;  %v1141_v41 = vsel %vm1140_vm3, %v1117_v31, %v1133_v32 }
 0x22c   : > { %v1145_v44 = vsel %vm1144_vm5, %v1141_v41, %v1143_v40 }
 0x22d   : > { %v1098_v0 = vadd.f32 %v1097_v11, %v1096_v6  ;;  %v1105_v17 = vadd.f32 %v1104_v12, %v1103_v7  ;;  %v1147_v42 = vsel %vm1146_vm6, %v1136_v36, %v1137_v37 }
 0x22f   : > { %v1099_v39 = vrot.slane %v1098_v0, 2  ;;  %v1106_v21 = vrot.slane %v1105_v17, 2 }
 0x231   : > { %v1100_v52 = vadd.f32 %v1099_v39, %v1098_v0  ;;  %v1107_v24 = vadd.f32 %v1106_v21, %v1105_v17 }
 0x233   : > { %v1101_v27 = vrot.slane %v1100_v52, 1  ;;  %v1108_v62 = vrot.slane %v1107_v24, 1 }
 0x235   : > { %v1102_v29 = vadd.f32 %v1101_v27, %v1100_v52  ;;  %v1109_v54 = vadd.f32 %v1108_v62, %v1107_v24 }
 0x237   : > { %v1123_v48 = vadd.f32 %v1116_v18, %v1102_v29  ;;  %v1124_v34 = vadd.f32 %v1116_v18, %v1109_v54 }
 0x239   : > { %v1138_v38 = vrot.slane %v1123_v48, 2  ;;  %v1139_v15 = vrot.slane %v1124_v34, 1 }
 0x23b   : > { %v1149_v43 = vsel %vm1148_vm7, %v1138_v38, %v1139_v15 }
 0x23c   : > { %v1151_v45 = vsel %vm1150_vm8, %v1147_v42, %v1149_v43 }
 0x23d   : > { %v1152_v46 = vsel %vm418_vm0, %v1145_v44, %v1151_v45 }
 0x23e   : > { %1154 = vst [vmem:[%s328_s28] sm:$0xff] %v1152_v46 }
 0x23f   : > { %1376 = shalt.err (!%p1373_p3)
}
 0x240   : > { %1306 = dma.vmem_to_hbm [thread:$0]  (%p1502_p5), %s1169_s29, 128, %s1171_s30, %s1156_s22  }
 0x241 PF: > { %p1312_p4 = scmp.ge.s32.totalorder %s1411_s14, 2  ;;  %s1182_s23 = sand.u32 1, %s1399_s11  }
 0x242   : > { %s1183_s26 = scalar_lea.sflag [#allocation4], %s1182_s23 }
 0x243   : > { %p1309_p7 = pnand %p1312_p4, %p1506_p6 }
 0x245   : > { %p1310_p8 = pneg %p1309_p7 }
 0x247   : > { %1394 = dma.done.wait (%p1310_p8), %s1183_s26, 128  }
 0x248   : > { %1396 = vsyncadd (%p1310_p8), %s1183_s26, 4294967168  ;;  %p21_p9 = scmp.ge.s32.totalorder %s1490_s16, 4   ;;  %s1811_s11 = smov %s1403_s12 }
 0x249   : > { %s1812_s12 = smov %s1407_s13  ;;  %s1813_s13 = smov %s1500_s19 }
 0x24a   : > { %s1814_s14 = smov %s1490_s16  ;;  %23 = sbr.rel (!%p21_p9) target bundleno = 6 (0x6), region = 91 }
 0x24f   :  { %1189 = vsyncpa [#allocation4], 1 }
 0x250   :  { %1191 = vsyncpa [#allocation4 + $0x1], 1 }

</bundles_post_ra>
